<compile_context>
chip_gen: v7x
topology: tpu7x:2x2x1
jax: 0.10.0
libtpu: 0.0.40
codegen_flags: <defaults>
</compile_context>

<pallas_src>
import numpy as np
import jax
import jax.numpy as jnp
from jax.experimental import pallas as pl
from jax.experimental.pallas import tpu as pltpu


# ----------------------------- Pallas kernel ------------------------------ #

def aware_pool_kernel(idx_ref, u_ref, mes_ref, out_ref):
    """One (cascade-block, hidden-slab) grid cell.

    idx_ref : (TB, S)   int32  message index per cascade slot, -1 = padding
    u_ref   : (TB, S)   f32    pre-masked weight scores (padding = -1e9)
    mes_ref : (Mp, TH)  f32    hidden-slab of the (padded) message table
    out_ref : (TB, TH)  f32    pooled cascade representations (this slab)
    """
    tb, s = u_ref.shape
    mp = mes_ref.shape[0]

    # softmax over the cascade axis (matches masked_fill(-1e9) + softmax).
    u = u_ref[...]                                      # (TB, S)
    m = jnp.max(u, axis=-1, keepdims=True)
    e = jnp.exp(u - m)
    denom = jnp.sum(e, axis=-1, keepdims=True)
    inv = pl.reciprocal(denom, approx=True)             # EUP slot
    inv = inv * (2.0 - denom * inv)                     # Newton step -> ~f32 exact
    w = e * inv                                         # (TB, S)

    # Scatter softmax weights into a dense (TB, Mp) weight matrix.  The -1
    # sentinel never matches the iota, so padded slots / padded batch rows
    # contribute exactly nothing.
    idx = idx_ref[...]                                  # (TB, S) int32
    lane = jax.lax.broadcasted_iota(jnp.int32, (tb, mp), 1)
    acc = jnp.zeros((tb, mp), jnp.float32)
    for s0 in range(s):                                 # static unroll; S = max cascade size (small)
        acc = acc + jnp.where(idx[:, s0:s0 + 1] == lane, w[:, s0:s0 + 1], 0.0)

    # Pooled output = W @ mes  on the MXU (f32 contract precision).
    out_ref[...] = jnp.dot(acc, mes_ref[...],
                           preferred_element_type=jnp.float32,
                           precision=jax.lax.Precision.HIGHEST)


# ------------------------- block / VMEM planning --------------------------- #

def _round_up(x, m):
    return ((x + m - 1) // m) * m


def _pick_blocks(num_cas, s_pad, mp, hp):
    """Generation-aware tile sizes: (tb rows/block, th hidden-slab, vmem_limit)."""
    try:
        info = pltpu.get_tpu_info()
        vmem_cap = int(getattr(info, "vmem_capacity_bytes", 0)) or 64 * 2**20
    except Exception:
        vmem_cap = 64 * 2**20                           # conservative (v7x: 64 MiB)
    budget = (vmem_cap * 3) // 5                        # ~60% of physical, headroom

    # Hidden-axis slab: keep the (conservatively double-buffered) resident
    # message-table slab at <= ~1/3 of the budget; th must divide hp and be a
    # multiple of 128 so stores stay lane-dense.
    n128 = hp // 128
    th = 128
    for c in range(1, n128 + 1):
        if n128 % c == 0 and 2 * mp * (128 * c) * 4 <= budget // 3:
            th = 128 * c
    # TODO(synk): if even a (Mp, 128) slab overflows VMEM (huge message batch),
    # add an Mp grid axis with "arbitrary" semantics and accumulate partial
    # matmuls; not needed at these sizes.

    table_bytes = 2 * mp * th * 4
    # per cascade-row live bytes: double-buffered idx+u and out blocks + W temp
    per_row = 2 * (2 * s_pad * 4) + 2 * th * 4 + mp * 4
    avail = max(budget - table_bytes, 8 * per_row)
    tb = int(max(8, min(avail // per_row, 512)))
    if num_cas > 8:                                     # keep >=2 grid steps (v7x: 2 TCs)
        tb = min(tb, _round_up((num_cas + 1) // 2, 8))
    tb = min(tb, _round_up(num_cas, 8))
    tb = max(8, (tb // 8) * 8)

    vmem_limit = int(max(32 * 2**20, min((vmem_cap * 4) // 5, 100 * 2**20)))
    return tb, th, vmem_limit


# ------------------------------ host-side glue ----------------------------- #

def _cas_structure(pids, s_multiple=8):
    """Replicates `_transform_mes_into_cas` index logic (static Python metadata)."""
    source_index = [i for i in range(len(pids)) if pids[i] == 'None']
    temp = source_index + [len(pids)]
    cas_index = [list(range(temp[i], temp[i + 1])) for i in range(len(source_index))]
    max_cas = max(len(ix) for ix in cas_index)
    s_pad = _round_up(max_cas, s_multiple)
    idx = np.full((len(cas_index), s_pad), -1, dtype=np.int32)   # -1 = padding sentinel
    for i, ix in enumerate(cas_index):
        idx[i, :len(ix)] = np.asarray(ix, dtype=np.int32)
    return idx, source_index


def integrate_forward(mes_update, yv, structure, yt_pred):
    """JAX/Pallas equivalent of Integrate.forward -> (cas, yv_cas)."""
    _cids, _mids, pids, _time = structure
    idx_np, source_index = _cas_structure(pids)
    num_cas, s_pad = idx_np.shape
    batch_mes, hidden = mes_update.shape

    hp = _round_up(hidden, 128)          # lane-dense hidden
    mp = _round_up(batch_mes, 128)       # contracting / scatter-lane dim

    tb, th, vmem_limit = _pick_blocks(num_cas, s_pad, mp, hp)
    b_pad = _round_up(num_cas, tb)

    # padded index table (static numpy); -1 marks padding everywhere.
    idx_full = np.full((b_pad, s_pad), -1, np.int32)
    idx_full[:num_cas] = idx_np
    idx = jnp.asarray(idx_full)

    # Weight projection with mm_tensor = [0,1,1,1] + masked_fill(-1e9), done
    # once in the wrapper (tiny (B,S) stream); the kernel sees only scores.
    score_mes = jnp.sum(yt_pred[:, 1:], axis=-1)                 # (batch_mes,)
    gathered = score_mes[jnp.maximum(idx, 0)]                    # (b_pad, s_pad)
    u_pre = jnp.where(idx < 0, jnp.float32(-1e9), gathered).astype(jnp.float32)

    # Un-gathered, padded message table: read once, resident in VMEM.
    if (mp, hp) != (batch_mes, hidden):
        mes_pad = jnp.pad(mes_update, ((0, mp - batch_mes), (0, hp - hidden)))
    else:
        mes_pad = mes_update
    mes_pad = mes_pad.astype(jnp.float32)

    out = pl.pallas_call(
        aware_pool_kernel,
        out_shape=jax.ShapeDtypeStruct((b_pad, hp), jnp.float32),
        grid_spec=pltpu.PrefetchScalarGridSpec(
            num_scalar_prefetch=0,
            grid=(b_pad // tb, hp // th),
            in_specs=[
                pl.BlockSpec((tb, s_pad), lambda b, h: (b, 0)),   # idx
                pl.BlockSpec((tb, s_pad), lambda b, h: (b, 0)),   # scores
                pl.BlockSpec((mp, th), lambda b, h: (0, h)),      # message table slab
            ],
            out_specs=pl.BlockSpec((tb, th), lambda b, h: (b, h)),
        ),
        compiler_params=pltpu.CompilerParams(
            dimension_semantics=("parallel", "parallel"),
            vmem_limit_bytes=vmem_limit,
        ),
    )(idx, u_pre, mes_pad)

    cas = out[:num_cas, :hidden]
    yv_cas = yv[jnp.asarray(source_index, jnp.int32)]
    return cas, yv_cas


# ------------------------------- reference -------------------------------- #

def _reference(mes_update, yv, structure, yt_pred):
    _cids, _mids, pids, _time = structure
    idx_np, source_index = _cas_structure(pids)
    idx = jnp.asarray(idx_np)
    valid = idx >= 0
    mask_f = valid.astype(jnp.float32)
    safe_idx = jnp.maximum(idx, 0)
    cas_all = mes_update[safe_idx] * mask_f[..., None]
    yt_cas = yt_pred[safe_idx] * mask_f[..., None]
    score = jnp.sum(yt_cas[..., 1:], axis=-1)            # == yt_cas @ [0,1,1,1]
    u = jnp.where(valid, score, jnp.float32(-1e9))
    u = jax.nn.softmax(u, axis=-1)
    s = jnp.sum(cas_all * u[..., None], axis=1)
    return s, yv[jnp.asarray(source_index, jnp.int32)]


# --------------------------------- main ------------------------------------ #

if __name__ == "__main__":
    key = jax.random.PRNGKey(0)
    k1, k2, k3 = jax.random.split(key, 3)

    batch_mes, hidden = 8, 32
    mes_update = jax.random.normal(k1, (batch_mes, hidden), dtype=jnp.float32)
    yv = jax.random.normal(k2, (batch_mes, hidden), dtype=jnp.float32)
    yt_pred = jax.nn.softmax(
        jax.random.normal(k3, (batch_mes, 4), dtype=jnp.float32), axis=-1)

    # 3 cascades with sizes [3, 2, 3]; 'None' marks a cascade source message.
    pids = ['None', 'p0', 'p0', 'None', 'p3', 'None', 'p5', 'p5']
    cids = list(range(batch_mes))
    mids = list(range(batch_mes))
    time = list(range(batch_mes))
    structure = (cids, mids, pids, time)

    cas, yv_cas = integrate_forward(mes_update, yv, structure, yt_pred)
    jax.block_until_ready((cas, yv_cas))

    cas_ref, yv_cas_ref = _reference(mes_update, yv, structure, yt_pred)
    assert cas.shape == (3, hidden) and yv_cas.shape == (3, hidden)
    assert np.allclose(np.asarray(cas), np.asarray(cas_ref), rtol=1e-4, atol=1e-4)
    assert np.allclose(np.asarray(yv_cas), np.asarray(yv_cas_ref))

    print("KERNEL_OK")
</pallas_src>

<mosaic_0001>
module attributes {stable_mosaic.version = 11 : i64} {
  func.func @aware_pool_kernel(%arg0: i32, %arg1: i32, %arg2: memref<8x8xi32, #tpu.memory_space<vmem>>, %arg3: memref<8x8xf32, #tpu.memory_space<vmem>>, %arg4: memref<128x128xf32, #tpu.memory_space<vmem>>, %arg5: memref<8x128xf32, #tpu.memory_space<vmem>>) attributes {dimension_semantics = [#tpu.dimension_semantics<parallel>, #tpu.dimension_semantics<parallel>], iteration_bounds = array<i64: 1, 1>, scalar_prefetch = 0 : i64, scratch_operands = 0 : i64, tpu.core_type = #tpu.core_type<tc>, window_params = [{transform_indices = @transform_0, window_bounds = array<i64: 8, 8>}, {transform_indices = @transform_1, window_bounds = array<i64: 8, 8>}, {transform_indices = @transform_2, window_bounds = array<i64: 128, 128>}, {transform_indices = @transform_3, window_bounds = array<i64: 8, 128>}]} {
    %c0 = arith.constant 0 : index
    %c0_0 = arith.constant 0 : index
    %0 = vector.load %arg3[%c0, %c0_0] : memref<8x8xf32, #tpu.memory_space<vmem>>, vector<8x8xf32>
    %cst = arith.constant dense<0xFF800000> : vector<8xf32>
    %1 = vector.multi_reduction <maximumf>, %0, %cst [1] : vector<8x8xf32> to vector<8xf32>
    %2 = vector.shape_cast %1 : vector<8xf32> to vector<8x1xf32>
    %3 = vector.broadcast %2 : vector<8x1xf32> to vector<8x8xf32>
    %4 = arith.subf %0, %3 : vector<8x8xf32>
    %5 = math.exp %4 : vector<8x8xf32>
    %cst_1 = arith.constant dense<0.000000e+00> : vector<8xf32>
    %6 = vector.multi_reduction <add>, %5, %cst_1 [1] : vector<8x8xf32> to vector<8xf32>
    %7 = vector.shape_cast %6 : vector<8xf32> to vector<8x1xf32>
    %8 = tpu.reciprocal %7 {approx = true} : vector<8x1xf32> -> vector<8x1xf32>
    %9 = arith.mulf %7, %8 : vector<8x1xf32>
    %cst_2 = arith.constant 2.000000e+00 : f32
    %10 = vector.broadcast %cst_2 : f32 to vector<8x1xf32>
    %11 = arith.subf %10, %9 : vector<8x1xf32>
    %12 = arith.mulf %8, %11 : vector<8x1xf32>
    %13 = vector.broadcast %12 : vector<8x1xf32> to vector<8x8xf32>
    %14 = arith.mulf %5, %13 : vector<8x8xf32>
    %c0_3 = arith.constant 0 : index
    %c0_4 = arith.constant 0 : index
    %15 = vector.load %arg2[%c0_3, %c0_4] : memref<8x8xi32, #tpu.memory_space<vmem>>, vector<8x8xi32>
    %16 = tpu.iota {dimensions = array<i32: 1>} : vector<8x128xi32>
    %cst_5 = arith.constant 0.000000e+00 : f32
    %17 = vector.broadcast %cst_5 : f32 to vector<8x128xf32>
    %18 = vector.extract_strided_slice %15 {offsets = [0, 0], sizes = [8, 1], strides = [1, 1]} : vector<8x8xi32> to vector<8x1xi32>
    %19 = vector.broadcast %18 : vector<8x1xi32> to vector<8x128xi32>
    %20 = arith.cmpi eq, %19, %16 : vector<8x128xi32>
    %21 = vector.extract_strided_slice %14 {offsets = [0, 0], sizes = [8, 1], strides = [1, 1]} : vector<8x8xf32> to vector<8x1xf32>
    %cst_6 = arith.constant 0.000000e+00 : f32
    %22 = vector.shape_cast %21 : vector<8x1xf32> to vector<8x1xf32>
    %23 = vector.broadcast %22 : vector<8x1xf32> to vector<8x128xf32>
    %24 = vector.broadcast %cst_6 : f32 to vector<8x128xf32>
    %25 = arith.select %20, %23, %24 : vector<8x128xi1>, vector<8x128xf32>
    %26 = arith.addf %17, %25 : vector<8x128xf32>
    %27 = vector.extract_strided_slice %15 {offsets = [0, 1], sizes = [8, 1], strides = [1, 1]} : vector<8x8xi32> to vector<8x1xi32>
    %28 = vector.broadcast %27 : vector<8x1xi32> to vector<8x128xi32>
    %29 = arith.cmpi eq, %28, %16 : vector<8x128xi32>
    %30 = vector.extract_strided_slice %14 {offsets = [0, 1], sizes = [8, 1], strides = [1, 1]} : vector<8x8xf32> to vector<8x1xf32>
    %cst_7 = arith.constant 0.000000e+00 : f32
    %31 = vector.shape_cast %30 : vector<8x1xf32> to vector<8x1xf32>
    %32 = vector.broadcast %31 : vector<8x1xf32> to vector<8x128xf32>
    %33 = vector.broadcast %cst_7 : f32 to vector<8x128xf32>
    %34 = arith.select %29, %32, %33 : vector<8x128xi1>, vector<8x128xf32>
    %35 = arith.addf %26, %34 : vector<8x128xf32>
    %36 = vector.extract_strided_slice %15 {offsets = [0, 2], sizes = [8, 1], strides = [1, 1]} : vector<8x8xi32> to vector<8x1xi32>
    %37 = vector.broadcast %36 : vector<8x1xi32> to vector<8x128xi32>
    %38 = arith.cmpi eq, %37, %16 : vector<8x128xi32>
    %39 = vector.extract_strided_slice %14 {offsets = [0, 2], sizes = [8, 1], strides = [1, 1]} : vector<8x8xf32> to vector<8x1xf32>
    %cst_8 = arith.constant 0.000000e+00 : f32
    %40 = vector.shape_cast %39 : vector<8x1xf32> to vector<8x1xf32>
    %41 = vector.broadcast %40 : vector<8x1xf32> to vector<8x128xf32>
    %42 = vector.broadcast %cst_8 : f32 to vector<8x128xf32>
    %43 = arith.select %38, %41, %42 : vector<8x128xi1>, vector<8x128xf32>
    %44 = arith.addf %35, %43 : vector<8x128xf32>
    %45 = vector.extract_strided_slice %15 {offsets = [0, 3], sizes = [8, 1], strides = [1, 1]} : vector<8x8xi32> to vector<8x1xi32>
    %46 = vector.broadcast %45 : vector<8x1xi32> to vector<8x128xi32>
    %47 = arith.cmpi eq, %46, %16 : vector<8x128xi32>
    %48 = vector.extract_strided_slice %14 {offsets = [0, 3], sizes = [8, 1], strides = [1, 1]} : vector<8x8xf32> to vector<8x1xf32>
    %cst_9 = arith.constant 0.000000e+00 : f32
    %49 = vector.shape_cast %48 : vector<8x1xf32> to vector<8x1xf32>
    %50 = vector.broadcast %49 : vector<8x1xf32> to vector<8x128xf32>
    %51 = vector.broadcast %cst_9 : f32 to vector<8x128xf32>
    %52 = arith.select %47, %50, %51 : vector<8x128xi1>, vector<8x128xf32>
    %53 = arith.addf %44, %52 : vector<8x128xf32>
    %54 = vector.extract_strided_slice %15 {offsets = [0, 4], sizes = [8, 1], strides = [1, 1]} : vector<8x8xi32> to vector<8x1xi32>
    %55 = vector.broadcast %54 : vector<8x1xi32> to vector<8x128xi32>
    %56 = arith.cmpi eq, %55, %16 : vector<8x128xi32>
    %57 = vector.extract_strided_slice %14 {offsets = [0, 4], sizes = [8, 1], strides = [1, 1]} : vector<8x8xf32> to vector<8x1xf32>
    %cst_10 = arith.constant 0.000000e+00 : f32
    %58 = vector.shape_cast %57 : vector<8x1xf32> to vector<8x1xf32>
    %59 = vector.broadcast %58 : vector<8x1xf32> to vector<8x128xf32>
    %60 = vector.broadcast %cst_10 : f32 to vector<8x128xf32>
    %61 = arith.select %56, %59, %60 : vector<8x128xi1>, vector<8x128xf32>
    %62 = arith.addf %53, %61 : vector<8x128xf32>
    %63 = vector.extract_strided_slice %15 {offsets = [0, 5], sizes = [8, 1], strides = [1, 1]} : vector<8x8xi32> to vector<8x1xi32>
    %64 = vector.broadcast %63 : vector<8x1xi32> to vector<8x128xi32>
    %65 = arith.cmpi eq, %64, %16 : vector<8x128xi32>
    %66 = vector.extract_strided_slice %14 {offsets = [0, 5], sizes = [8, 1], strides = [1, 1]} : vector<8x8xf32> to vector<8x1xf32>
    %cst_11 = arith.constant 0.000000e+00 : f32
    %67 = vector.shape_cast %66 : vector<8x1xf32> to vector<8x1xf32>
    %68 = vector.broadcast %67 : vector<8x1xf32> to vector<8x128xf32>
    %69 = vector.broadcast %cst_11 : f32 to vector<8x128xf32>
    %70 = arith.select %65, %68, %69 : vector<8x128xi1>, vector<8x128xf32>
    %71 = arith.addf %62, %70 : vector<8x128xf32>
    %72 = vector.extract_strided_slice %15 {offsets = [0, 6], sizes = [8, 1], strides = [1, 1]} : vector<8x8xi32> to vector<8x1xi32>
    %73 = vector.broadcast %72 : vector<8x1xi32> to vector<8x128xi32>
    %74 = arith.cmpi eq, %73, %16 : vector<8x128xi32>
    %75 = vector.extract_strided_slice %14 {offsets = [0, 6], sizes = [8, 1], strides = [1, 1]} : vector<8x8xf32> to vector<8x1xf32>
    %cst_12 = arith.constant 0.000000e+00 : f32
    %76 = vector.shape_cast %75 : vector<8x1xf32> to vector<8x1xf32>
    %77 = vector.broadcast %76 : vector<8x1xf32> to vector<8x128xf32>
    %78 = vector.broadcast %cst_12 : f32 to vector<8x128xf32>
    %79 = arith.select %74, %77, %78 : vector<8x128xi1>, vector<8x128xf32>
    %80 = arith.addf %71, %79 : vector<8x128xf32>
    %81 = vector.extract_strided_slice %15 {offsets = [0, 7], sizes = [8, 1], strides = [1, 1]} : vector<8x8xi32> to vector<8x1xi32>
    %82 = vector.broadcast %81 : vector<8x1xi32> to vector<8x128xi32>
    %83 = arith.cmpi eq, %82, %16 : vector<8x128xi32>
    %84 = vector.extract_strided_slice %14 {offsets = [0, 7], sizes = [8, 1], strides = [1, 1]} : vector<8x8xf32> to vector<8x1xf32>
    %cst_13 = arith.constant 0.000000e+00 : f32
    %85 = vector.shape_cast %84 : vector<8x1xf32> to vector<8x1xf32>
    %86 = vector.broadcast %85 : vector<8x1xf32> to vector<8x128xf32>
    %87 = vector.broadcast %cst_13 : f32 to vector<8x128xf32>
    %88 = arith.select %83, %86, %87 : vector<8x128xi1>, vector<8x128xf32>
    %89 = arith.addf %80, %88 : vector<8x128xf32>
    %c0_14 = arith.constant 0 : index
    %c0_15 = arith.constant 0 : index
    %90 = vector.load %arg4[%c0_14, %c0_15] : memref<128x128xf32, #tpu.memory_space<vmem>>, vector<128x128xf32>
    %cst_16 = arith.constant dense<0.000000e+00> : vector<8x128xf32>
    %91 = tpu.matmul %89, %90, %cst_16 {dimension_numbers = #tpu.dot_dimension_numbers<[1], [0], [0], [1], [0, 0, 1, 1], [], []>, precision = #tpu.contract_precision<fp32>} : vector<8x128xf32>, vector<128x128xf32>, vector<8x128xf32> -> vector<8x128xf32>
    %c0_17 = arith.constant 0 : index
    %c0_18 = arith.constant 0 : index
    %92 = vector.load %arg5[%c0_17, %c0_18] : memref<8x128xf32, #tpu.memory_space<vmem>>, vector<8x128xf32>
    tpu.vector_store %arg5[%c0_17, %c0_18], %91 {strides = array<i32>} : memref<8x128xf32, #tpu.memory_space<vmem>>, vector<8x128xf32>,
    return
  }
  func.func @transform_0(%arg0: i32, %arg1: i32) -> (i32, i32) {
    %c0_i32 = arith.constant 0 : i32
    %c0_i32_0 = arith.constant 0 : i32
    return %arg0, %c0_i32 : i32, i32
  }
  func.func @transform_1(%arg0: i32, %arg1: i32) -> (i32, i32) {
    %c0_i32 = arith.constant 0 : i32
    %c0_i32_0 = arith.constant 0 : i32
    return %arg0, %c0_i32 : i32, i32
  }
  func.func @transform_2(%arg0: i32, %arg1: i32) -> (i32, i32) {
    %c0_i32 = arith.constant 0 : i32
    %c0_i32_0 = arith.constant 0 : i32
    return %c0_i32, %arg1 : i32, i32
  }
  func.func @transform_3(%arg0: i32, %arg1: i32) -> (i32, i32) {
    %c0_i32 = arith.constant 0 : i32
    return %arg0, %arg1 : i32, i32
  }
}

</mosaic_0001>

<bundles_post_ra>
// kernel: tpu_custom_call.1
= control target key start
LH: loop header
LB: loop body
LE: loop exit
PB: predicated region body
PF: predicated region fallthrough
CT: control target
= control target key end

     0   :  { %8 = vsyncpa [#allocation3], 0  ;;  %s1788_s0 = inlined_call_operand.hbm [shape: s32[8,8], index: 0, kind: input, shape index: {}]   ;;  %s1789_s1 = inlined_call_operand.hbm [shape: f32[8,8], index: 1, kind: input, shape index: {}]   ;;  %s1790_s2 = inlined_call_operand.hbm [shape: f32[128,128], index: 2, kind: input, shape index: {}]   ;;  %s1791_s3 = inlined_call_operand.hbm [shape: f32[8,128], index: 3, kind: output, shape index: {}]  }
   0x1   :  { %9 = vsyncpa [#allocation6], 0 }
   0x2   :  { %10 = vsyncpa [#allocation4], 0  ;;  %s1422_s12 = smov [#allocation5]   ;;  %s1423_s14 = smov [#allocation2]  }
   0x3   :  { %s27_s13 = sshll.u32 %s1422_s12, 4  ;;  %s17_s15 = sshll.u32 %s1423_s14, 4  ;;  %s28_s13 = int_to_ptr.vmem [resolvable:$true] %s27_s13  ;;  %s18_s15 = int_to_ptr.vmem [resolvable:$true] %s17_s15 }
   0x4   :  { %s1328_s18 = scalar_lea.hbm %s1789_s1, 128 }
   0x5   :  { %p1329_p0 = scmp.ne.s32.totalorder %s1789_s1, %s1328_s18  ;;  %p1332_p1 = scmp.lt.u32.totalorder %s1328_s18, %s1789_s1 }
   0x7   :  { %p1334_p2 = pnand %p1332_p1, %p1329_p0 }
   0x9   :  { %1337 = shalt.err (!%p1334_p2)
}
   0xa   :  { %s1338_s23 = scalar_lea.vmem %s28_s13, 128  ;;  %p1343_p4 = scmp.lt.s32.totalorder %s28_s13, %s28_s13 }
   0xb   :  { %p1339_p3 = scmp.ne.s32.totalorder %s28_s13, %s1338_s23  ;;  %p1344_p5 = scmp.lt.s32.totalorder %s1338_s23, %s1338_s23 }
   0xd   :  { %p1345_p6 = por %p1344_p5, %p1343_p4 }
   0xf   :  { %p1346_p7 = pnand %p1345_p6, %p1339_p3 }
  0x11   :  { %1349 = shalt.err (!%p1346_p7)
}
  0x12   :  { %30 = dma.hbm_to_vmem [thread:$0]  %s1789_s1, 128, %s28_s13, [#allocation6]  }
  0x13   :  { %s1350_s28 = scalar_lea.hbm %s1788_s0, 128 }
  0x14   :  { %p1351_p8 = scmp.ne.s32.totalorder %s1788_s0, %s1350_s28  ;;  %p1354_p9 = scmp.lt.u32.totalorder %s1350_s28, %s1788_s0 }
  0x16   :  { %p1356_p10 = pnand %p1354_p9, %p1351_p8 }
  0x18   :  { %1359 = shalt.err (!%p1356_p10)
}
  0x19   :  { %s1360_s6 = scalar_lea.vmem %s18_s15, 128  ;;  %p1365_p12 = scmp.lt.s32.totalorder %s18_s15, %s18_s15 }
  0x1a   :  { %p1361_p11 = scmp.ne.s32.totalorder %s18_s15, %s1360_s6  ;;  %p1366_p13 = scmp.lt.s32.totalorder %s1360_s6, %s1360_s6 }
  0x1c   :  { %p1367_p0 = por %p1366_p13, %p1365_p12 }
  0x1e   :  { %p1368_p1 = pnand %p1367_p0, %p1361_p11 }
  0x20   :  { %1371 = shalt.err (!%p1368_p1)
}
  0x21   :  { %20 = dma.hbm_to_vmem [thread:$0]  %s1788_s0, 128, %s18_s15, [#allocation3]  }
  0x22   :  { %s1424_s8 = smov [#allocation7]   ;;  %s1372_s12 = scalar_lea.hbm %s1790_s2, 2048 }
  0x23   :  { %s36_s9 = sshll.u32 %s1424_s8, 4  ;;  %p1373_p2 = scmp.ne.s32.totalorder %s1790_s2, %s1372_s12  ;;  %s37_s9 = int_to_ptr.vmem [resolvable:$true] %s36_s9 }
  0x24   :  { %p1376_p3 = scmp.lt.u32.totalorder %s1372_s12, %s1790_s2 }
  0x26   :  { %p1378_p4 = pnand %p1376_p3, %p1373_p2 }
  0x28   :  { %1381 = shalt.err (!%p1378_p4)
}
  0x29   :  { %s1382_s18 = scalar_lea.vmem %s37_s9, 2048  ;;  %p1387_p6 = scmp.lt.s32.totalorder %s37_s9, %s37_s9 }
  0x2a   :  { %p1383_p5 = scmp.ne.s32.totalorder %s37_s9, %s1382_s18  ;;  %p1388_p7 = scmp.lt.s32.totalorder %s1382_s18, %s1382_s18 }
  0x2c   :  { %p1389_p8 = por %p1388_p7, %p1387_p6 }
  0x2e   :  { %p1390_p9 = pnand %p1389_p8, %p1383_p5 }
  0x30   :  { %1393 = shalt.err (!%p1390_p9)
}
  0x31   :  { %s1425_s0 = smov 128   ;;  %s1426_s15 = smov 8  }
  0x32   :  { %42 = dma.hbm_to_vmem [thread:$0]  %s1790_s2, 2048, %s37_s9, [#allocation6], %s1425_s0, %s1425_s0, %s1426_s15  }
  0x33   :  { %1416 = dma.done.wait [#allocation3], 128  }
  0x34   :  { %1417 = vsyncadd [#allocation3], 4294967168 }
  0x35   :  { %1418 = dma.done.wait [#allocation6], 2176  }
  0x36   :  { %1419 = vsyncadd [#allocation6], 4294965120  ;;  %vm53_vm0 = vcmask 64512   ;;  %v52_v0 = vld [vmem:[#allocation5] sm:$0xff]  ;;  %v68_v2 = vld [vmem:[#allocation2] sm:$0xff]  ;;  %v1427_v3 = vmov 0  }
  0x37   :  { %v54_v1 = vsel %vm53_vm0, %v52_v0, -inf  ;;  %1308 = vset.pattern.permute.xlu1 %v1427_v3  ;;  %1310 = vset.pattern.permute.xlu0 %v1427_v3  ;;  %v1428_v4 = vmov 1   ;;  %v1429_v5 = vmov 2   ;;  %v1430_v6 = vmov 3   ;;  %v152_v21 = vld [vmem:[#allocation7] sm:$0xff]  ;;  %v153_v22 = vld [vmem:[#allocation7 + $0x8] sm:$0xff] }
  0x38   :  { %55 = vmax.xlane.f32.xlu0 %v54_v1  ;;  %72 = vperm.xlu1 %1308, %v68_v2   ;;  %v1431_v12 = vmov 4   ;;  %v1432_v13 = vmov 5   ;;  %v1433_v14 = vmov 6   ;;  %v169_v23 = vand.u32 4294901760, %v152_v21  ;;  %v154_v30 = vld [vmem:[#allocation7 + $0x10] sm:$0xff]  ;;  %v155_v31 = vld [vmem:[#allocation7 + $0x18] sm:$0xff] }
  0x39   :  { %v172_v24 = vand.u32 4294901760, %v153_v22  ;;  %v1434_v25 = vmov 7   ;;  %v1792_v27 = vmov 0.0|0.0   ;;  %v175_v32 = vand.u32 4294901760, %v154_v30  ;;  %v156_v35 = vld [vmem:[#allocation7 + $0x20] sm:$0xff]  ;;  %v157_v36 = vld [vmem:[#allocation7 + $0x28] sm:$0xff] }
  0x3a   :  { %1210 = vmatprep.subr.bf16.mxu0 %v1792_v27  ;;  %v1508_v28 = vsub.f32 %v152_v21, %v169_v23  ;;  %1138 = vmatprep.subr.bf16.mxu1 %v1792_v27  ;;  %v178_v33 = vand.u32 4294901760, %v155_v31  ;;  %v181_v39 = vand.u32 4294901760, %v156_v35  ;;  %v184_v40 = vand.u32 4294901760, %v157_v36  ;;  %v158_v42 = vld [vmem:[#allocation7 + $0x30] sm:$0xff]  ;;  %v159_v43 = vld [vmem:[#allocation7 + $0x38] sm:$0xff]  ;;  %v160_v51 = vld [vmem:[#allocation7 + $0x40] sm:$0xff] }
  0x3b   :  { %v1505_v26 = vpack.c.bf16 %v172_v24, %v169_v23  ;;  %v1510_v29 = vsub.f32 %v153_v22, %v172_v24  ;;  %v1520_v37 = vsub.f32 %v154_v30, %v175_v32  ;;  %v187_v44 = vand.u32 4294901760, %v158_v42  ;;  %v161_v52 = vld [vmem:[#allocation7 + $0x48] sm:$0xff]  ;;  %v162_v58 = vld [vmem:[#allocation7 + $0x50] sm:$0xff]  ;;  %v163_v59 = vld [vmem:[#allocation7 + $0x58] sm:$0xff]  ;;  %s1438_s2 = smov [#allocation8]  }
  0x3c   :  { %1309 = vset.pattern.permute.xlu1 %v1428_v4  ;;  %v1517_v34 = vpack.c.bf16 %v178_v33, %v175_v32  ;;  %v1522_v38 = vsub.f32 %v155_v31, %v178_v33  ;;  %v1528_v41 = vpack.c.bf16 %v184_v40, %v181_v39  ;;  %v190_v45 = vand.u32 4294901760, %v159_v43  ;;  %v164_v1 = vld [vmem:[#allocation7 + $0x60] sm:$0xff]  ;;  %s816_s21 = sshll.u32 %s1438_s2, 4  ;;  %s817_s21 = int_to_ptr.vmem [resolvable:$true] %s816_s21 }
  0x3d   :  { %83 = vperm.xlu1 %1309, %v68_v2   ;;  %1212 = vmatpush3.bf16.msra.mxu0 %v1505_v26  ;;  %v1532_v46 = vsub.f32 %v156_v35, %v181_v39  ;;  %v1534_v47 = vsub.f32 %v157_v36, %v184_v40  ;;  %v1540_v49 = vsub.f32 %v158_v42, %v187_v44  ;;  %v193_v53 = vand.u32 4294901760, %v160_v51  ;;  %s1394_s22 = scalar_lea.vmem %s817_s21, 128  ;;  %p1399_p11 = scmp.lt.s32.totalorder %s817_s21, %s817_s21 }
  0x3e   :  { %1140 = vmatpush3.bf16.msra.mxu1 %v1505_v26  ;;  %1213 = vmatprep.subr.bf16.mxu0 %v1792_v27  ;;  %v1538_v48 = vpack.c.bf16 %v190_v45, %v187_v44  ;;  %v1542_v50 = vsub.f32 %v159_v43, %v190_v45  ;;  %v196_v54 = vand.u32 4294901760, %v161_v52  ;;  %v199_v60 = vand.u32 4294901760, %v162_v58  ;;  %p1395_p10 = scmp.ne.s32.totalorder %s817_s21, %s1394_s22  ;;  %p1400_p12 = scmp.lt.s32.totalorder %s1394_s22, %s1394_s22 }
  0x3f   :  { %1141 = vmatprep.subr.bf16.mxu1 %v1792_v27  ;;  %v1552_v56 = vsub.f32 %v160_v51, %v193_v53  ;;  %v202_v61 = vand.u32 4294901760, %v163_v59  ;;  %v205_v3 = vand.u32 4294901760, %v164_v1  ;;  %vm1436_vm1 = vmmov 0  }
  0x40   :  { %v1550_v55 = vpack.c.bf16 %v196_v54, %v193_v53  ;;  %v1554_v57 = vsub.f32 %v161_v52, %v196_v54  ;;  %v1564_v63 = vsub.f32 %v162_v58, %v199_v60  ;;  %v276_v23 = vand.u32 4294901760, %v1520_v37  ;;  %p1401_p13 = por %p1400_p12, %p1399_p11 }
  0x41   :  { %1311 = vset.pattern.permute.xlu1 %v1429_v5  ;;  %1215 = vmatpush3.bf16.msra.mxu0 %v1517_v34  ;;  %v1562_v62 = vpack.c.bf16 %v202_v61, %v199_v60  ;;  %v283_v24 = vand.u32 4294901760, %v1522_v38  ;;  %v290_v36 = vand.u32 4294901760, %v1532_v46  ;;  %v297_v39 = vand.u32 4294901760, %v1534_v47 }
  0x42   :  { %93 = vperm.xlu1 %1311, %v68_v2   ;;  %1143 = vmatpush3.bf16.msra.mxu1 %v1517_v34  ;;  %v277_v31 = vsub.f32 %v1520_v37, %v276_v23  ;;  %v304_v52 = vand.u32 4294901760, %v1540_v49  ;;  %v311_v53 = vand.u32 4294901760, %v1542_v50  ;;  %p1402_p0 = pnand %p1401_p13, %p1395_p10 }
  0x43   :  { %1216 = vmatprep.subr.bf16.mxu0 %v1792_v27  ;;  %1144 = vmatprep.subr.bf16.mxu1 %v1792_v27  ;;  %v1609_v30 = vpack.c.bf16 %v283_v24, %v276_v23  ;;  %v284_v32 = vsub.f32 %v1522_v38, %v283_v24  ;;  %v1617_v42 = vpack.c.bf16 %v297_v39, %v290_v36 }
  0x44   :  { %v278_v33 = vand.u32 4294901760, %v277_v31  ;;  %v291_v43 = vsub.f32 %v1532_v46, %v290_v36  ;;  %v298_v44 = vsub.f32 %v1534_v47, %v297_v39  ;;  %v1625_v58 = vpack.c.bf16 %v311_v53, %v304_v52 }
  0x45   :  { %1218 = vmatpush3.bf16.msra.mxu0 %v1528_v41  ;;  %v285_v35 = vand.u32 4294901760, %v284_v32  ;;  %v312_v60 = vsub.f32 %v1542_v50, %v311_v53 }
  0x46   :  { %1312 = vset.pattern.permute.xlu1 %v1430_v6  ;;  %1219 = vmatprep.subr.bf16.mxu0 %v1792_v27  ;;  %v292_v45 = vand.u32 4294901760, %v291_v43  ;;  %v299_v51 = vand.u32 4294901760, %v298_v44 }
  0x47   :  { %103 = vperm.xlu1 %1312, %v68_v2   ;;  %1146 = vmatpush3.bf16.msra.mxu1 %v1528_v41  ;;  %v1615_v40 = vpack.c.bf16 %v285_v35, %v278_v33 }
  0x48   :  { %1147 = vmatprep.subr.bf16.mxu1 %v1792_v27  ;;  %v1623_v54 = vpack.c.bf16 %v299_v51, %v292_v45 }
  0x49   :  { %1221 = vmatpush3.bf16.msra.mxu0 %v1538_v48 }
  0x4a   :  { %1222 = vmatprep.subr.bf16.mxu0 %v1792_v27 }
  0x4b   :  { %1313 = vset.pattern.permute.xlu1 %v1431_v12  ;;  %1149 = vmatpush3.bf16.msra.mxu1 %v1538_v48 }
  0x4c   :  { %113 = vperm.xlu1 %1313, %v68_v2   ;;  %1150 = vmatprep.subr.bf16.mxu1 %v1792_v27 }
  0x4d   :  { %1224 = vmatpush3.bf16.msra.mxu0 %v1550_v55 }
  0x4e   :  { %1225 = vmatprep.subr.bf16.mxu0 %v1792_v27 }
  0x4f   :  { %1152 = vmatpush3.bf16.msra.mxu1 %v1550_v55 }
  0x50   :  { %1314 = vset.pattern.permute.xlu1 %v1432_v13  ;;  %1153 = vmatprep.subr.bf16.mxu1 %v1792_v27 }
  0x51   :  { %123 = vperm.xlu1 %1314, %v68_v2   ;;  %1227 = vmatpush3.bf16.msra.mxu0 %v1562_v62 }
  0x52   :  { %1228 = vmatprep.subr.bf16.mxu0 %v1792_v27 }
  0x53   :  { %1155 = vmatpush3.bf16.msra.mxu1 %v1562_v62 }
  0x54   :  { %1156 = vmatprep.subr.bf16.mxu1 %v1792_v27 }
  0x55   :  { %1315 = vset.pattern.permute.xlu1 %v1433_v14 }
  0x56   :  { %133 = vperm.xlu1 %1315, %v68_v2  }
  0x5a   :  { %1316 = vset.pattern.permute.xlu1 %v1428_v4 }
  0xc5   :  { %v56_v7 = vpop.xlane.xlu0 %55 }
  0xc6   :  { %v57_v8 = vsub.f32 %v52_v0, %v56_v7  ;;  %v1566_v0 = vsub.f32 %v163_v59, %v202_v61  ;;  %v167_v7 = vld [vmem:[#allocation7 + $0x78] sm:$0xff]  ;;  %v305_v59 = vsub.f32 %v1540_v49, %v304_v52 }
  0xc8   :  { %v58_v9 = vmul.f32 1.442695, %v57_v8  ;;  %v306_v61 = vand.u32 4294901760, %v305_v59 }
  0xca   :  { %1324 = vpow2.f32 %v58_v9  ;;  %v214_v9 = vand.u32 4294901760, %v167_v7 }
  0xd4   :  { %v1325_v10 = vpop.eup %1324 }
  0xd5   :  { %v60_v11 = vsel %vm53_vm0, %v1325_v10, 0.0 }
  0xd6   :  { %61 = vadd.xlane.f32.xlu0 %v60_v11  ;;  %v1583_v11 = vsub.f32 %v164_v1, %v205_v3  ;;  %v313_v1 = vand.u32 4294901760, %v312_v60 }
  0xd8   :  { %v346_v32 = vand.u32 4294901760, %v1583_v11 }
  0xda   :  { %v347_v39 = vsub.f32 %v1583_v11, %v346_v32 }
  0xdc   :  { %v348_v44 = vand.u32 4294901760, %v347_v39 }
 0x163   :  { %v62_v15 = vpop.xlane.xlu0 %61 }
 0x164   :  { %1326 = vrcp.f32 %v62_v15 }
 0x16e   :  { %v1327_v16 = vpop.eup %1326 }
 0x16f   :  { %v64_v17 = vmul.f32 %v1327_v16, %v62_v15  ;;  %v262_v15 = vand.u32 4294901760, %v1508_v28 }
 0x171   :  { %v65_v18 = vsub.f32 2.0, %v64_v17  ;;  %v1794_v17 = vmov 0.0  }
 0x172   :  { %1065 = vmatprep.mubr.msk.f32.mxu0 %vm1436_vm1, %v1794_v17  ;;  %960 = vmatprep.mubr.msk.f32.mxu1 %vm1436_vm1, %v1794_v17 }
 0x173   :  { %v66_v19 = vmul.f32 %v1327_v16, %v65_v18  ;;  %v269_v16 = vand.u32 4294901760, %v1510_v29 }
 0x175   :  { %v1499_v20 = vmul.f32 %v1325_v10, %v66_v19  ;;  %v1598_v18 = vpack.c.bf16 %v269_v16, %v262_v15  ;;  %v263_v19 = vsub.f32 %v1508_v28, %v262_v15 }
 0x177   :  { %87 = vperm.xlu1 %1316, %v1499_v20   ;;  %77 = vperm.xlu0 %1310, %v1499_v20   ;;  %v264_v21 = vand.u32 4294901760, %v263_v19  ;;  %v339_v19 = vand.u32 4294901760, %v1566_v0 }
 0x179   :  { %v340_v23 = vsub.f32 %v1566_v0, %v339_v19 }
 0x17b   :  { %1317 = vset.pattern.permute.xlu1 %v1429_v5  ;;  %1322 = vset.pattern.permute.xlu0 %v1434_v25  ;;  %v341_v31 = vand.u32 4294901760, %v340_v23 }
 0x17c   :  { %97 = vperm.xlu1 %1317, %v1499_v20   ;;  %143 = vperm.xlu0 %1322, %v68_v2   ;;  %v165_v2 = vld [vmem:[#allocation7 + $0x68] sm:$0xff] }
 0x17d   :  { %v208_v4 = vand.u32 4294901760, %v165_v2 }
 0x17f   :  { %v1573_v5 = vpack.c.bf16 %v208_v4, %v205_v3  ;;  %v325_v3 = vand.u32 4294901760, %v1554_v57 }
 0x180   :  { %1318 = vset.pattern.permute.xlu1 %v1430_v6  ;;  %v166_v6 = vld [vmem:[#allocation7 + $0x70] sm:$0xff] }
 0x181   :  { %107 = vperm.xlu1 %1318, %v1499_v20   ;;  %1230 = vmatpush3.bf16.msra.mxu0 %v1573_v5  ;;  %v211_v8 = vand.u32 4294901760, %v166_v6 }
 0x182   :  { %1231 = vmatprep.subr.bf16.mxu0 %v1792_v27  ;;  %1158 = vmatpush3.bf16.msra.mxu1 %v1573_v5 }
 0x183   :  { %v1580_v10 = vpack.c.bf16 %v214_v9, %v211_v8  ;;  %1159 = vmatprep.subr.bf16.mxu1 %v1792_v27 }
 0x185   :  { %1319 = vset.pattern.permute.xlu1 %v1431_v12  ;;  %v1585_v12 = vsub.f32 %v165_v2, %v208_v4  ;;  %1233 = vmatpush3.bf16.msra.mxu0 %v1580_v10  ;;  %v318_v2 = vand.u32 4294901760, %v1552_v56  ;;  %v1631_v4 = vpack.c.bf16 %v313_v1, %v306_v61 }
 0x186   :  { %117 = vperm.xlu1 %1319, %v1499_v20   ;;  %1234 = vmatprep.subr.bf16.mxu0 %v1792_v27 }
 0x187   :  { %1161 = vmatpush3.bf16.msra.mxu1 %v1580_v10  ;;  %v353_v33 = vand.u32 4294901760, %v1585_v12 }
 0x188   :  { %1162 = vmatprep.subr.bf16.mxu1 %v1792_v27 }
 0x189   :  { %v1649_v36 = vpack.c.bf16 %v353_v33, %v346_v32  ;;  %v354_v43 = vsub.f32 %v1585_v12, %v353_v33 }
 0x18a   :  { %1320 = vset.pattern.permute.xlu1 %v1432_v13  ;;  %v1587_v13 = vsub.f32 %v166_v6, %v211_v8  ;;  %v1633_v6 = vpack.c.bf16 %v325_v3, %v318_v2  ;;  %v326_v8 = vsub.f32 %v1554_v57, %v325_v3 }
 0x18b   :  { %127 = vperm.xlu1 %1320, %v1499_v20   ;;  %v355_v45 = vand.u32 4294901760, %v354_v43 }
 0x18c   :  { %1798 = vst [vmem:[#allocation12_spill] sm:$0xff] %v1587_v13  ;;  %v327_v15 = vand.u32 4294901760, %v326_v8  ;;  %v360_v51 = vand.u32 4294901760, %v1587_v13 }
 0x18d   :  { %v1655_v53 = vpack.c.bf16 %v355_v45, %v348_v44 }
 0x18e   :  { %v361_v60 = vsub.f32 %v1587_v13, %v360_v51 }
 0x18f   :  { %1321 = vset.pattern.permute.xlu1 %v1433_v14  ;;  %v1589_v14 = vsub.f32 %v167_v7, %v214_v9  ;;  %v319_v7 = vsub.f32 %v1552_v56, %v318_v2 }
 0x190   :  { %137 = vperm.xlu1 %1321, %v1499_v20   ;;  %v362_v1 = vand.u32 4294901760, %v361_v60 }
 0x191   :  { %1799 = vst [vmem:[#allocation13_spill] sm:$0xff] %v1589_v14  ;;  %v320_v9 = vand.u32 4294901760, %v319_v7  ;;  %v367_v52 = vand.u32 4294901760, %v1589_v14 }
 0x193   :  { %v1657_v59 = vpack.c.bf16 %v367_v52, %v360_v51  ;;  %v368_v61 = vsub.f32 %v1589_v14, %v367_v52  ;;  %v69_v52 = vlaneseq }
 0x194   :  { %1323 = vset.pattern.permute.xlu1 %v1434_v25 }
 0x195   :  { %147 = vperm.xlu1 %1323, %v1499_v20   ;;  %v270_v20 = vsub.f32 %v1510_v29, %v269_v16  ;;  %v332_v16 = vand.u32 4294901760, %v1564_v63  ;;  %v369_v2 = vand.u32 4294901760, %v368_v61  ;;  %v70_v61 = vand.u32 127, %v69_v52 }
 0x197   :  { %v271_v22 = vand.u32 4294901760, %v270_v20  ;;  %v1639_v20 = vpack.c.bf16 %v327_v15, %v320_v9  ;;  %v1661_v3 = vpack.c.bf16 %v369_v2, %v362_v1  ;;  %v73_v15 = vpop.permute.xlu1 %72 }
 0x198   :  { %vm74_vm2 = vcmp.eq.s32.totalorder %v73_v15, %v70_v61 }
 0x199   :  { %v1607_v25 = vpack.c.bf16 %v271_v22, %v264_v21  ;;  %v1641_v21 = vpack.c.bf16 %v339_v19, %v332_v16  ;;  %v333_v22 = vsub.f32 %v1564_v63, %v332_v16 }
 0x19b   :  { %v334_v24 = vand.u32 4294901760, %v333_v22  ;;  %v84_v22 = vpop.permute.xlu1 %83 }
 0x19c   :  { %vm85_vm3 = vcmp.eq.s32.totalorder %v84_v22, %v70_v61 }
 0x19d   :  { %v1647_v35 = vpack.c.bf16 %v341_v31, %v334_v24 }
 0x19f   :  { %v94_v24 = vpop.permute.xlu1 %93 }
 0x1a0   :  { %vm95_vm4 = vcmp.eq.s32.totalorder %v94_v24, %v70_v61 }
 0x1a3   :  { %v104_v33 = vpop.permute.xlu1 %103 }
 0x1a4   :  { %vm105_vm5 = vcmp.eq.s32.totalorder %v104_v33, %v70_v61 }
 0x1a7   :  { %v114_v39 = vpop.permute.xlu1 %113 }
 0x1a8   :  { %vm115_vm6 = vcmp.eq.s32.totalorder %v114_v39, %v70_v61 }
 0x1ab   :  { %v124_v43 = vpop.permute.xlu1 %123 }
 0x1ac   :  { %vm125_vm7 = vcmp.eq.s32.totalorder %v124_v43, %v70_v61 }
 0x1af   :  { %v134_v44 = vpop.permute.xlu1 %133 }
 0x1b0   :  { %vm135_vm8 = vcmp.eq.s32.totalorder %v134_v44, %v70_v61 }
 0x1f6   :  { %v88_v45 = vpop.permute.xlu1 %87  ;;  %v78_v1 = vpop.permute.xlu0 %77 }
 0x1f7   :  { %v90_v23 = vsel %vm85_vm3, %v88_v45, 0.0  ;;  %v80_v19 = vsel %vm74_vm2, %v78_v1, 0.0 }
 0x1f8   :  { %v91_v16 = vadd.f32 %v90_v23, %v80_v19 }
 0x1fb   :  { %v98_v51 = vpop.permute.xlu1 %97  ;;  %v144_v52 = vpop.permute.xlu0 %143 }
 0x1fc   :  { %v100_v31 = vsel %vm95_vm4, %v98_v51, 0.0  ;;  %vm145_vm9 = vcmp.eq.s32.totalorder %v144_v52, %v70_v61 }
 0x1fd   :  { %v101_v8 = vadd.f32 %v100_v31, %v91_v16 }
 0x200   :  { %v108_v60 = vpop.permute.xlu1 %107 }
 0x201   :  { %v110_v9 = vsel %vm105_vm5, %v108_v60, 0.0 }
 0x202   :  { %v111_v27 = vadd.f32 %v110_v9, %v101_v8 }
 0x205   :  { %v118_v2 = vpop.permute.xlu1 %117 }
 0x206   :  { %v120_v7 = vsel %vm115_vm6, %v118_v2, 0.0 }
 0x207   :  { %v121_v14 = vadd.f32 %v120_v7, %v111_v27  ;;  %v1800_v27 = vmov 0.0  }
 0x20a   :  { %v128_v32 = vpop.permute.xlu1 %127 }
 0x20b   :  { %v130_v17 = vsel %vm125_vm7, %v128_v32, 0.0 }
 0x20c   :  { %v131_v22 = vadd.f32 %v130_v17, %v121_v14  ;;  %v1802_v17 = vpack.c.bf16 %v1510_v29, %v1508_v28  ;;  %v1804_v28 = vpack.c.bf16 %v1534_v47, %v1532_v46  ;;  %v1805_v29 = vpack.c.bf16 %v1542_v50, %v1540_v49  ;;  %v1810_v46 = vld [vmem:[#allocation12_spill] sm:$0xff] }
 0x20f   :  { %v138_v13 = vpop.permute.xlu1 %137 }
 0x210   :  { %v140_v15 = vsel %vm135_vm8, %v138_v13, 0.0  ;;  %v1801_v13 = vmov 0.0|0.0  }
 0x211   :  { %v141_v45 = vadd.f32 %v140_v15, %v131_v22 }
 0x214   :  { %v148_v24 = vpop.permute.xlu1 %147 }
 0x215   :  { %v150_v51 = vsel %vm145_vm9, %v148_v24, 0.0 }
 0x216   :  { %v151_v33 = vadd.f32 %v150_v51, %v141_v45 }
 0x218   :  { %v1679_v19 = vand.u32 4294901760, %v151_v33 }
 0x21a   :  { %v1682_v23 = vsub.f32 %v151_v33, %v1679_v19 }
 0x21c   :  { %v251_v16 = vand.u32 4294901760, %v1682_v23 }
 0x21e   :  { %1066 = vmatmul.mubr.f32.vlgmr.msra.gmra.mrb[0].mxu0 %v251_v16  ;;  %v252_v8 = vsub.f32 %v1682_v23, %v251_v16 }
 0x21f   :  { %1236 = vmatpush3.bf16.msra.mxu0 %v1598_v18  ;;  %1100 = vmatprep.mubr.msk.f32.mxu0 %vm1436_vm1, %v1800_v27 }
 0x220   :  { %1237 = vmatprep.subr.bf16.mxu0 %v1801_v13  ;;  %v253_v14 = vand.u32 4294901760, %v252_v8 }
 0x222   :  { %961 = vmatmul.mubr.f32.vlgmr.msra.gmra.mrb[0].mxu1 %v253_v14 }
 0x223   :  { %1164 = vmatpush3.bf16.msra.mxu1 %v1607_v25  ;;  %1239 = vmatpush3.bf16.msra.mxu0 %v1609_v30 }
 0x224   :  { %1165 = vmatprep.subr.bf16.mxu1 %v1801_v13  ;;  %1240 = vmatprep.subr.bf16.mxu0 %v1801_v13 }
 0x225   :  { %995 = vmatprep.mubr.msk.f32.mxu1 %vm1436_vm1, %v1800_v27 }
 0x227   :  { %1167 = vmatpush3.bf16.msra.mxu1 %v1615_v40  ;;  %1242 = vmatpush3.bf16.msra.mxu0 %v1617_v42 }
 0x228   :  { %1168 = vmatprep.subr.bf16.mxu1 %v1801_v13  ;;  %1243 = vmatprep.subr.bf16.mxu0 %v1801_v13 }
 0x22b   :  { %1170 = vmatpush3.bf16.msra.mxu1 %v1623_v54  ;;  %1245 = vmatpush3.bf16.msra.mxu0 %v1625_v58 }
 0x22c   :  { %1171 = vmatprep.subr.bf16.mxu1 %v1801_v13  ;;  %1246 = vmatprep.subr.bf16.mxu0 %v1801_v13 }
 0x22f   :  { %1173 = vmatpush3.bf16.msra.mxu1 %v1631_v4  ;;  %1248 = vmatpush3.bf16.msra.mxu0 %v1633_v6 }
 0x230   :  { %1174 = vmatprep.subr.bf16.mxu1 %v1801_v13  ;;  %1249 = vmatprep.subr.bf16.mxu0 %v1801_v13 }
 0x233   :  { %1176 = vmatpush3.bf16.msra.mxu1 %v1639_v20  ;;  %1251 = vmatpush3.bf16.msra.mxu0 %v1641_v21 }
 0x234   :  { %1177 = vmatprep.subr.bf16.mxu1 %v1801_v13  ;;  %1252 = vmatprep.subr.bf16.mxu0 %v1801_v13 }
 0x237   :  { %1179 = vmatpush3.bf16.msra.mxu1 %v1647_v35  ;;  %1254 = vmatpush3.bf16.msra.mxu0 %v1649_v36 }
 0x238   :  { %1180 = vmatprep.subr.bf16.mxu1 %v1801_v13  ;;  %1255 = vmatprep.subr.bf16.mxu0 %v1801_v13 }
 0x23b   :  { %1182 = vmatpush3.bf16.msra.mxu1 %v1655_v53  ;;  %1257 = vmatpush3.bf16.msra.mxu0 %v1657_v59 }
 0x23c   :  { %1183 = vmatprep.subr.bf16.mxu1 %v1801_v13  ;;  %1258 = vmatprep.subr.bf16.mxu0 %v1801_v13 }
 0x23e   :  { %1101 = vmatmul.mubr.f32.vlgmr.msra.gmra.mrb[0].mxu0 %v1679_v19 }
 0x23f   :  { %1185 = vmatpush3.bf16.msra.mxu1 %v1661_v3  ;;  %1260 = vmatpush3.bf16.msra.mxu0 %v1505_v26  ;;  %v1803_v26 = vpack.c.bf16 %v1522_v38, %v1520_v37  ;;  %v1807_v37 = vpack.c.bf16 %v1566_v0, %v1564_v63  ;;  %v1808_v38 = vpack.c.bf16 %v1585_v12, %v1583_v11 }
 0x240   :  { %1186 = vmatprep.subr.bf16.mxu1 %v1801_v13  ;;  %1261 = vmatprep.subr.bf16.mxu0 %v1801_v13 }
 0x241   :  { %1135 = vmatprep.mubr.msk.f32.mxu0 %vm1436_vm1, %v1800_v27 }
 0x242   :  { %996 = vmatmul.mubr.f32.vlgmr.msra.gmra.mrb[0].mxu1 %v1679_v19 }
 0x243   :  { %1188 = vmatpush3.bf16.msra.mxu1 %v1802_v17  ;;  %1263 = vmatpush3.bf16.msra.mxu0 %v1517_v34  ;;  %v1806_v34 = vpack.c.bf16 %v1554_v57, %v1552_v56 }
 0x244   :  { %1189 = vmatprep.subr.bf16.mxu1 %v1801_v13  ;;  %1264 = vmatprep.subr.bf16.mxu0 %v1801_v13 }
 0x245   :  { %1030 = vmatprep.mubr.msk.f32.mxu1 %vm1436_vm1, %v1800_v27 }
 0x247   :  { %1191 = vmatpush3.bf16.msra.mxu1 %v1803_v26  ;;  %1266 = vmatpush3.bf16.msra.mxu0 %v1528_v41  ;;  %v1809_v41 = vld [vmem:[#allocation13_spill] sm:$0xff] }
 0x248   :  { %1192 = vmatprep.subr.bf16.mxu1 %v1801_v13  ;;  %1267 = vmatprep.subr.bf16.mxu0 %v1801_v13  ;;  %v1811_v47 = vpack.c.bf16 %v1809_v41, %v1810_v46 }
 0x24b   :  { %1194 = vmatpush3.bf16.msra.mxu1 %v1804_v28  ;;  %1269 = vmatpush3.bf16.msra.mxu0 %v1538_v48 }
 0x24c   :  { %1195 = vmatprep.subr.bf16.mxu1 %v1801_v13  ;;  %1270 = vmatprep.subr.bf16.mxu0 %v1801_v13 }
 0x24f   :  { %1197 = vmatpush3.bf16.msra.mxu1 %v1805_v29  ;;  %1272 = vmatpush3.bf16.msra.mxu0 %v1550_v55 }
 0x250   :  { %1198 = vmatprep.subr.bf16.mxu1 %v1801_v13  ;;  %1273 = vmatprep.subr.bf16.mxu0 %v1801_v13 }
 0x253   :  { %1200 = vmatpush3.bf16.msra.mxu1 %v1806_v34  ;;  %1275 = vmatpush3.bf16.msra.mxu0 %v1562_v62 }
 0x254   :  { %1201 = vmatprep.subr.bf16.mxu1 %v1801_v13  ;;  %1276 = vmatprep.subr.bf16.mxu0 %v1801_v13 }
 0x257   :  { %1203 = vmatpush3.bf16.msra.mxu1 %v1807_v37  ;;  %1278 = vmatpush3.bf16.msra.mxu0 %v1573_v5 }
 0x258   :  { %1204 = vmatprep.subr.bf16.mxu1 %v1801_v13  ;;  %1279 = vmatprep.subr.bf16.mxu0 %v1801_v13 }
 0x25b   :  { %1206 = vmatpush3.bf16.msra.mxu1 %v1808_v38  ;;  %1281 = vmatpush3.bf16.msra.mxu0 %v1580_v10 }
 0x25c   :  { %1207 = vmatprep.subr.bf16.mxu1 %v1801_v13 }
 0x25e   :  { %1136 = vmatmul.mubr.f32.vlgmr.msra.gmra.mrb[0].mxu0 %v1679_v19 }
 0x25f   :  { %1209 = vmatpush3.bf16.msra.mxu1 %v1811_v47 }
 0x262   :  { %1031 = vmatmul.mubr.f32.vlgmr.msra.gmra.mrb[0].mxu1 %v1682_v23 }
 0x331   :  { %v805_v48 = vpop.f32.mrb[0].mxu0 }
 0x332   :  { %v1137_v49 = vpop.f32.mrb[1].mxu0 }
 0x335   :  { %v510_v50 = vpop.f32.mrb[0].mxu1 }
 0x336   :  { %v1282_v55 = vadd.f32 %v805_v48, %v510_v50  ;;  %v1032_v56 = vpop.f32.mrb[1].mxu1 }
 0x338   :  { %809 = vst [vmem:[#allocation8] sm:$0xff] %v1282_v55 }
 0x339   :  { %1405 = shalt.err (!%p1402_p0)
}
 0x33a   :  { %s1406_s25 = scalar_lea.hbm %s1791_s3, 128 }
 0x33b   :  { %p1407_p1 = scmp.ne.s32.totalorder %s1791_s3, %s1406_s25  ;;  %p1410_p2 = scmp.lt.u32.totalorder %s1406_s25, %s1791_s3 }
 0x33d   :  { %p1412_p3 = pnand %p1410_p2, %p1407_p1 }
 0x33f   :  { %1415 = shalt.err (!%p1412_p3)
}
 0x340   :  { %819 = dma.vmem_to_hbm [thread:$0]  %s817_s21, 128, %s1791_s3, [#allocation4]  }
 0x341   :  { %1420 = dma.done.wait [#allocation4], 128  }
 0x342   :  { %1421 = vsyncadd [#allocation4], 4294967168 }
 0x343   :  { %823 = vsyncpa [#allocation3], 1 }
 0x344   :  { %824 = vsyncpa [#allocation6], 1 }
 0x345   :  { %825 = vsyncpa [#allocation4], 1 }

</bundles_post_ra>
